<compile_context>
chip_gen: v6e
topology: v6e:2x2x1
jax: 0.10.0
libtpu: 0.0.40
codegen_flags: <defaults>
</compile_context>

<pallas_src>
import functools

import jax
import jax.numpy as jnp
from jax.experimental import pallas as pl
from jax.experimental.pallas import tpu as pltpu


def _entropy_partial_kernel(x_ref, partial_ref, *, inv_tau, n_rows, tile_n, mask_rows):
    # Scale by 1/tau with a single constant multiply (no per-element divide);
    # compute in f32 regardless of input dtype.
    x = x_ref[...].astype(jnp.float32) * inv_tau                # (tile_n, C)

    # Row-wise entropy: H_row = log(s) - sum(e * (x - m)) / s
    m = jnp.max(x, axis=1, keepdims=True)                       # XLU row max
    xm = x - m
    e = jnp.exp(xm)                                             # EUP
    s = jnp.sum(e, axis=1, keepdims=True)                       # XLU row reduce
    num = jnp.sum(e * xm, axis=1, keepdims=True)                # XLU row reduce
    h_rows = jnp.log(s) - num / s                               # (tile_n, 1)

    if mask_rows:
        # Invariant (do not break in future refactors): rows past n_rows in the
        # partial last tile may contain arbitrary garbage (possibly NaN/Inf),
        # but every reduction above is per-row (axis=1), so garbage cannot leak
        # across rows. This per-row SELECT (not a multiply) discards it.
        i = pl.program_id(0)
        row_ids = jax.lax.broadcasted_iota(jnp.int32, (tile_n, 1), 0)
        valid = row_ids < (n_rows - i * tile_n)                 # (tile_n, 1)
        h_rows = jnp.where(valid, h_rows, 0.0)

    # Per-block partial sum, broadcast into a lane-dense (8, 128) output block.
    partial = jnp.sum(h_rows)
    partial_ref[...] = jnp.full((8, 128), partial, dtype=jnp.float32)


def entropy_loss(x, tau=0.1, tile_n=None):
    n, c = x.shape
    itemsize = jnp.dtype(x.dtype).itemsize
    # Packed sublane multiple: 8 for 4-byte, 16 for 2-byte, 32 for 1-byte dtypes.
    sub_mult = max(8, 32 // itemsize)
    row_bytes = c * itemsize

    # Generation-aware VMEM limit: 128 MiB physical on v5e/v6e, 64 MiB on v7x.
    try:
        vmem_cap = int(pltpu.get_tpu_info().vmem_capacity_bytes)
    except Exception:
        vmem_cap = 64 * 1024 * 1024                       # conservative (v7x)
    if vmem_cap >= 100 * 1024 * 1024:
        vmem_limit = 64 * 1024 * 1024                     # v5e / v6e
    else:
        vmem_limit = 40 * 1024 * 1024                     # v7x: stay well under 64 MiB

    if tile_n is None:
        # ~8 MiB per input buffer (double-buffered by Pallas -> ~16 MiB), the
        # mem-bound sweet spot; bigger blocks buy ~1% and risk VMEM pressure.
        tile_n = (8 * 1024 * 1024) // max(row_bytes, 1)
    tile_n = max(sub_mult, (tile_n // sub_mult) * sub_mult)

    # Guarantee >= 4 grid blocks when n is large enough so the "parallel" grid
    # axis can be sharded across v7x's 2 TensorCores (harmless on v5e/v6e).
    min_blocks = 4
    cap = ((n // min_blocks) // sub_mult) * sub_mult
    if cap >= sub_mult:
        tile_n = min(tile_n, cap)

    if tile_n >= n:
        tile_n = n                    # single block; block dim == full dim is always legal
    grid_n = pl.cdiv(n, tile_n)
    mask_rows = (n % tile_n) != 0     # only emit row-masking code when needed

    kernel = functools.partial(
        _entropy_partial_kernel,
        inv_tau=float(1.0 / tau),
        n_rows=n,
        tile_n=tile_n,
        mask_rows=mask_rows,
    )

    partial_blocks = pl.pallas_call(
        kernel,
        out_shape=jax.ShapeDtypeStruct((grid_n * 8, 128), jnp.float32),
        grid=(grid_n,),
        in_specs=[pl.BlockSpec((tile_n, c), lambda i: (i, 0))],
        out_specs=pl.BlockSpec((8, 128), lambda i: (i, 0)),
        compiler_params=pltpu.CompilerParams(
            dimension_semantics=("parallel",),
            vmem_limit_bytes=vmem_limit,
        ),
    )(x)

    # Each (8,128) block holds its partial sum broadcast; pick one scalar per block.
    partials = partial_blocks.reshape(grid_n, 8, 128)[:, 0, 0]
    return jnp.sum(partials) / jnp.float32(n)


def entropy_loss_ref(x, tau=0.1):
    x = x.astype(jnp.float32) / tau
    p = jax.nn.softmax(x, axis=1)
    logp = jax.nn.log_softmax(x, axis=1)
    return -jnp.sum(p * logp) / x.shape[0]


if __name__ == "__main__":
    key = jax.random.PRNGKey(0)
    # batch=8 logits over 32 classes
    x = jax.random.normal(key, (8, 32), dtype=jnp.float32)

    out = jax.block_until_ready(entropy_loss(x, tau=0.1))
    ref = entropy_loss_ref(x, tau=0.1)
    assert jnp.allclose(out, ref, rtol=1e-5, atol=1e-5), (out, ref)

    # Multi-tile + row-masking path (n=20 rows, tile_n=8 -> grid of 3 with a
    # masked partial last tile).
    x2 = jax.random.normal(jax.random.PRNGKey(1), (20, 32), dtype=jnp.float32)
    out2 = jax.block_until_ready(entropy_loss(x2, tau=0.1, tile_n=8))
    ref2 = entropy_loss_ref(x2, tau=0.1)
    assert jnp.allclose(out2, ref2, rtol=1e-5, atol=1e-5), (out2, ref2)

    # Auto-tiling path with >= 4 blocks (exercises the multi-block cap) in bf16
    # input dtype (native-dtype DMA, f32 in-kernel compute).
    x3 = jax.random.normal(jax.random.PRNGKey(2), (64, 128), dtype=jnp.bfloat16)
    out3 = jax.block_until_ready(entropy_loss(x3, tau=0.1))
    ref3 = entropy_loss_ref(x3, tau=0.1)
    assert jnp.allclose(out3, ref3, rtol=2e-3, atol=2e-3), (out3, ref3)

    print("KERNEL_OK")
</pallas_src>

<mosaic_0001>
module attributes {stable_mosaic.version = 11 : i64} {
  func.func @_entropy_partial_kernel(%arg0: i32, %arg1: memref<8x32xf32, #tpu.memory_space<vmem>>, %arg2: memref<8x128xf32, #tpu.memory_space<vmem>>) attributes {dimension_semantics = [#tpu.dimension_semantics<parallel>], iteration_bounds = array<i64: 1>, scalar_prefetch = 0 : i64, scratch_operands = 0 : i64, tpu.core_type = #tpu.core_type<tc>, window_params = [{transform_indices = @transform_0, window_bounds = array<i64: 8, 32>}, {transform_indices = @transform_1, window_bounds = array<i64: 8, 128>}]} {
    %c0 = arith.constant 0 : index
    %c0_0 = arith.constant 0 : index
    %0 = vector.load %arg1[%c0, %c0_0] : memref<8x32xf32, #tpu.memory_space<vmem>>, vector<8x32xf32>
    %cst = arith.constant 1.000000e+01 : f32
    %1 = vector.broadcast %cst : f32 to vector<8x32xf32>
    %2 = arith.mulf %0, %1 : vector<8x32xf32>
    %cst_1 = arith.constant dense<0xFF800000> : vector<8xf32>
    %3 = vector.multi_reduction <maximumf>, %2, %cst_1 [1] : vector<8x32xf32> to vector<8xf32>
    %4 = vector.shape_cast %3 : vector<8xf32> to vector<8x1xf32>
    %5 = vector.broadcast %4 : vector<8x1xf32> to vector<8x32xf32>
    %6 = arith.subf %2, %5 : vector<8x32xf32>
    %7 = math.exp %6 : vector<8x32xf32>
    %cst_2 = arith.constant dense<0.000000e+00> : vector<8xf32>
    %8 = vector.multi_reduction <add>, %7, %cst_2 [1] : vector<8x32xf32> to vector<8xf32>
    %9 = vector.shape_cast %8 : vector<8xf32> to vector<8x1xf32>
    %10 = arith.mulf %7, %6 : vector<8x32xf32>
    %cst_3 = arith.constant dense<0.000000e+00> : vector<8xf32>
    %11 = vector.multi_reduction <add>, %10, %cst_3 [1] : vector<8x32xf32> to vector<8xf32>
    %12 = vector.shape_cast %11 : vector<8xf32> to vector<8x1xf32>
    %13 = math.log %9 : vector<8x1xf32>
    %14 = arith.divf %12, %9 : vector<8x1xf32>
    %15 = arith.subf %13, %14 : vector<8x1xf32>
    %16 = vector.shape_cast %15 : vector<8x1xf32> to vector<1x8x1xf32>
    %cst_4 = arith.constant dense<0.000000e+00> : vector<1xf32>
    %17 = vector.multi_reduction <add>, %16, %cst_4 [1, 2] : vector<1x8x1xf32> to vector<1xf32>
    %18 = vector.shape_cast %17 : vector<1xf32> to vector<1x1x1xf32>
    %19 = vector.extract %18[0, 0, 0] : f32 from vector<1x1x1xf32>
    %20 = vector.broadcast %19 : f32 to vector<8x128xf32>
    %c0_5 = arith.constant 0 : index
    %c0_6 = arith.constant 0 : index
    %21 = vector.load %arg2[%c0_5, %c0_6] : memref<8x128xf32, #tpu.memory_space<vmem>>, vector<8x128xf32>
    tpu.vector_store %arg2[%c0_5, %c0_6], %20 {strides = array<i32>} : memref<8x128xf32, #tpu.memory_space<vmem>>, vector<8x128xf32>,
    return
  }
  func.func @transform_0(%arg0: i32) -> (i32, i32) {
    %c0_i32 = arith.constant 0 : i32
    %c0_i32_0 = arith.constant 0 : i32
    return %arg0, %c0_i32 : i32, i32
  }
  func.func @transform_1(%arg0: i32) -> (i32, i32) {
    %c0_i32 = arith.constant 0 : i32
    %c0_i32_0 = arith.constant 0 : i32
    return %arg0, %c0_i32 : i32, i32
  }
}

</mosaic_0001>

<bundles_post_ra>
// kernel: tpu_custom_call.1
= control target key start
LH: loop header
LB: loop body
LE: loop exit
PB: predicated region body
PF: predicated region fallthrough
CT: control target
= control target key end

     0   :  { %6 = vsyncpa [#allocation3], 0  ;;  %s142_s0 = inlined_call_operand.hbm [shape: f32[8,32], index: 0, kind: input, shape index: {}]   ;;  %s143_s1 = inlined_call_operand.hbm [shape: f32[8,128], index: 1, kind: output, shape index: {}]  }
   0x1   :  { %7 = vsyncpa [#allocation4], 0  ;;  %s124_s6 = smov [#allocation2]  }
   0x2   :  { %s14_s7 = sshll.u32 %s124_s6, 4  ;;  %s15_s7 = int_to_ptr.vmem [resolvable:$true] %s14_s7 }
   0x3   :  { %s88_s8 = scalar_lea.vmem %s15_s7, 128  ;;  %p93_p1 = scmp.lt.s32.totalorder %s15_s7, %s15_s7 }
   0x4   :  { %p89_p0 = scmp.ne.s32.totalorder %s15_s7, %s88_s8  ;;  %p94_p2 = scmp.lt.s32.totalorder %s88_s8, %s88_s8 }
   0x6   :  { %p95_p3 = por %p94_p2, %p93_p1 }
   0x8   :  { %p96_p4 = pnand %p95_p3, %p89_p0 }
   0xa   :  { %99 = shalt.err (!%p96_p4)
}
   0xb   :  { %17 = dma.hbm_to_vmem [thread:$0]  %s142_s0, 128, %s15_s7, [#allocation3]  }
   0xc   :  { %120 = dma.done.wait [#allocation3], 128  }
   0xd   :  { %121 = vsyncadd [#allocation3], 4294967168  ;;  %v21_v0 = vld [vmem:[#allocation2] sm:$0xff]  ;;  %vm23_vm0 = vcmask 261120   ;;  %vm42_vm1 = vcmask 7168   ;;  %s125_s0 = smov [#allocation5]  }
   0xe   :  { %v22_v1 = vmul.f32 10.0, %v21_v0  ;;  %s61_s11 = sshll.u32 %s125_s0, 4  ;;  %s62_s11 = int_to_ptr.vmem [resolvable:$true] %s61_s11 }
   0xf   :  { %s100_s13 = scalar_lea.vmem %s62_s11, 128  ;;  %p105_p6 = scmp.lt.s32.totalorder %s62_s11, %s62_s11 }
  0x10   :  { %v24_v2 = vsel %vm23_vm0, %v22_v1, -inf  ;;  %p101_p5 = scmp.ne.s32.totalorder %s62_s11, %s100_s13  ;;  %p106_p7 = scmp.lt.s32.totalorder %s100_s13, %s100_s13 }
  0x11   :  { %25 = vmax.xlane.f32.xlu0 %v24_v2 }
  0x12   :  { %p107_p8 = por %p106_p7, %p105_p6 }
  0x14   :  { %p108_p9 = pnand %p107_p8, %p101_p5 }
  0x9a   :  { %v26_v3 = vpop.xlane.xlu0 %25 }
  0x9b   :  { %v27_v4 = vsub.f32 %v22_v1, %v26_v3 }
  0x9d   :  { %v28_v5 = vmul.f32 1.442695, %v27_v4 }
  0x9f   :  { %74 = vpow2.f32 %v28_v5 }
  0xac   :  { %v75_v6 = vpop.eup %74 }
  0xad   :  { %v30_v7 = vsel %vm23_vm0, %v75_v6, 0.0  ;;  %v33_v8 = vmul.f32 %v75_v6, %v27_v4 }
  0xae   :  { %31 = vadd.xlane.f32.xlu0 %v30_v7 }
  0xaf   :  { %v34_v9 = vsel %vm23_vm0, %v33_v8, 0.0 }
  0xb0   :  { %35 = vadd.xlane.f32.xlu1 %v34_v9 }
 0x137   :  { %v32_v10 = vpop.xlane.xlu0 %31 }
 0x138   :  { %76 = vlog2.f32 %v32_v10 }
 0x139   :  { %78 = vrcp.f32 %v32_v10  ;;  %v36_v14 = vpop.xlane.xlu1 %35 }
 0x145   :  { %v77_v11 = vpop.eup %76 }
 0x146   :  { %v79_v12 = vpop.eup %78  ;;  %v38_v13 = vmul.f32 0.6931472, %v77_v11 }
 0x147   :  { %v40_v15 = vmul.f32 %v79_v12, %v36_v14 }
 0x149   :  { %v41_v16 = vsub.f32 %v38_v13, %v40_v15 }
 0x14b   :  { %v43_v17 = vsel %vm42_vm1, %v41_v16, 0.0 }
 0x14c   :  { %44 = vadd.xlane.f32.xlu1 %v43_v17 }
 0x1d5   :  { %v45_v18 = vpop.xlane.xlu1 %44 }
 0x1d6   :  { %v46_v19 = vrot.slane %v45_v18, 4 }
 0x1d8   :  { %v47_v20 = vadd.f32 %v46_v19, %v45_v18 }
 0x1da   :  { %v48_v21 = vrot.slane %v47_v20, 2 }
 0x1dc   :  { %v49_v22 = vadd.f32 %v48_v21, %v47_v20 }
 0x1de   :  { %v50_v23 = vrot.slane %v49_v22, 1 }
 0x1e0   :  { %v51_v24 = vadd.f32 %v50_v23, %v49_v22 }
 0x1e2   :  { %70 = vpush %v51_v24 }
 0x213   :  { %s71_s12 = spop %70 }
 0x214   :  { %v53_v25 = vstv %s71_s12 }
 0x215   :  { %54 = vst [vmem:[#allocation5] sm:$0xff] %v53_v25 }
 0x216   :  { %111 = shalt.err (!%p108_p9)
}
 0x217   :  { %64 = dma.vmem_to_hbm [thread:$0]  %s62_s11, 128, %s143_s1, [#allocation4]  }
 0x218   :  { %122 = dma.done.wait [#allocation4], 128  }
 0x219   :  { %123 = vsyncadd [#allocation4], 4294967168 }
 0x21a   :  { %68 = vsyncpa [#allocation3], 1 }
 0x21b   :  { %69 = vsyncpa [#allocation4], 1 }

</bundles_post_ra>
